<compile_context>
chip_gen: v6e
topology: v6e:2x2x1
jax: 0.10.0
libtpu: 0.0.40
codegen_flags: <defaults>
</compile_context>

<pallas_src>
import functools

import jax
import jax.numpy as jnp
from jax import lax
from jax.experimental import pallas as pl
from jax.experimental.pallas import tpu as pltpu


def _round_up(x, m):
    return (x + m - 1) // m * m


# ---------------------------------------------------------------------------
# Kernel 1: fused Q/K/V projection  (qkv = x @ [Wq*scale | Wk | Wv], once).
# ---------------------------------------------------------------------------
def _qkv_proj_kernel(x_ref, w_ref, qkv_ref):
    qkv_ref[...] = jnp.dot(
        x_ref[...], w_ref[...], preferred_element_type=jnp.float32
    ).astype(qkv_ref.dtype)


# ---------------------------------------------------------------------------
# Kernel 2: flash-style attention over the precomputed (pre-scaled) Q/K/V.
# ---------------------------------------------------------------------------
def _flash_attn_kernel(q_ref, k_ref, v_ref, o_ref, m_scr, l_scr, acc_scr):
    ki = pl.program_id(1)

    @pl.when(ki == 0)
    def _init():
        m_scr[...] = jnp.full(m_scr.shape, -jnp.inf, dtype=jnp.float32)
        l_scr[...] = jnp.zeros(l_scr.shape, dtype=jnp.float32)
        acc_scr[...] = jnp.zeros(acc_scr.shape, dtype=jnp.float32)

    # Scores: contract the feature axis directly (q @ k^T, no XLU transpose).
    # Q already carries the 1/sqrt(d_out) scale (folded into Wq on the host).
    s = lax.dot_general(
        q_ref[...], k_ref[...],
        dimension_numbers=(((1,), (1,)), ((), ())),
        preferred_element_type=jnp.float32)

    # Online softmax; statistics kept in f32 (exp in f32: portable incl. v5e).
    m_prev = m_scr[...]
    m_new = jnp.maximum(m_prev, jnp.max(s, axis=-1, keepdims=True))
    alpha = jnp.exp(m_prev - m_new)
    p = jnp.exp(s - m_new)
    l_scr[...] = alpha * l_scr[...] + jnp.sum(p, axis=-1, keepdims=True)
    acc_scr[...] = alpha * acc_scr[...] + jnp.dot(
        p.astype(v_ref.dtype), v_ref[...], preferred_element_type=jnp.float32)
    m_scr[...] = m_new

    @pl.when(ki == pl.num_programs(1) - 1)
    def _finalize():
        # Exact divide (runs once per q tile -> essentially free; keeps
        # parity with the reference softmax normalization).
        o_ref[...] = (acc_scr[...] / l_scr[...]).astype(o_ref.dtype)


def self_attention_v1(x, w_queries, w_keys, w_values, *,
                      tq=None, tk=None, ts=None, mxu_dtype=jnp.bfloat16):
    """Single-head self-attention: softmax(x Wq (x Wk)^T / sqrt(d_out)) x Wv."""
    seq, d_in = x.shape
    d_out = w_queries.shape[1]
    out_dtype = x.dtype

    # Lane-align each weight segment to a multiple of 128 so the Q/K/V column
    # blocks never cross an (8,128) tile; fold the score scale into Wq.
    dp = _round_up(d_out, 128)
    pad = dp - d_out
    scale = 1.0 / (float(d_out) ** 0.5)

    def _segment(w, s=1.0):
        w = (w * s).astype(mxu_dtype)
        if pad:
            w = jnp.pad(w, ((0, 0), (0, pad)))
        return w

    w_fused = jnp.concatenate(
        [_segment(w_queries, scale), _segment(w_keys), _segment(w_values)],
        axis=1)                                   # (d_in, 3*dp)
    x_mxu = x.astype(mxu_dtype)

    # ---------------- projection: computed exactly once ----------------
    ts = ts or min(seq, 256)
    # TODO(synk): pad / mask sequences that are not a multiple of the tiles.
    assert seq % ts == 0, "seq must be divisible by the projection tile"
    n_s = seq // ts
    in_item = jnp.dtype(mxu_dtype).itemsize

    proj_cost = pl.CostEstimate(
        flops=2 * seq * d_in * 3 * dp,
        transcendentals=0,
        bytes_accessed=in_item * (seq * d_in + d_in * 3 * dp + seq * 3 * dp),
    )

    qkv = pl.pallas_call(
        _qkv_proj_kernel,
        out_shape=jax.ShapeDtypeStruct((seq, 3 * dp), mxu_dtype),
        grid_spec=pltpu.PrefetchScalarGridSpec(
            num_scalar_prefetch=0,
            grid=(n_s,),
            in_specs=[
                pl.BlockSpec((ts, d_in), lambda si: (si, 0)),
                # Constant block index -> fetched once (no re-DMA per step).
                # TODO(synk): single-buffer this slab (pl.Buffered(1)) to
                # reclaim one W copy of VMEM for very large d_in.
                pl.BlockSpec((d_in, 3 * dp), lambda si: (0, 0)),
            ],
            out_specs=pl.BlockSpec((ts, 3 * dp), lambda si: (si, 0)),
        ),
        compiler_params=pltpu.CompilerParams(
            dimension_semantics=("parallel",),
        ),
        cost_estimate=proj_cost,
    )(x_mxu, w_fused)

    # ---------------- flash attention over the cached Q/K/V ----------------
    # Grow the parallel (q) tile first; keep tk <= 128 so the live (tq, tk)
    # f32 score/prob tiles stay within the vreg file.
    tq = tq or min(seq, 256)
    tk = tk or min(seq, 128)
    assert seq % tq == 0 and seq % tk == 0, "seq must be divisible by tiles"
    n_q, n_kv = seq // tq, seq // tk

    flash_cost = pl.CostEstimate(
        flops=4 * seq * seq * dp,                       # q@k^T and p@v
        transcendentals=seq * seq,                      # exp
        bytes_accessed=(in_item * (seq * dp + 2 * n_q * seq * dp)
                        + jnp.dtype(out_dtype).itemsize * seq * dp),
    )

    out_p = pl.pallas_call(
        _flash_attn_kernel,
        out_shape=jax.ShapeDtypeStruct((seq, dp), out_dtype),
        grid_spec=pltpu.PrefetchScalarGridSpec(
            num_scalar_prefetch=0,
            grid=(n_q, n_kv),
            in_specs=[
                # Q / K / V are lane-aligned column blocks of the same slab.
                pl.BlockSpec((tq, dp), lambda qi, ki: (qi, 0)),   # Q rows
                pl.BlockSpec((tk, dp), lambda qi, ki: (ki, 1)),   # K rows
                pl.BlockSpec((tk, dp), lambda qi, ki: (ki, 2)),   # V rows
            ],
            out_specs=pl.BlockSpec((tq, dp), lambda qi, ki: (qi, 0)),
            scratch_shapes=[
                pltpu.VMEM((tq, 1), jnp.float32),    # running max
                pltpu.VMEM((tq, 1), jnp.float32),    # running denominator
                pltpu.VMEM((tq, dp), jnp.float32),   # output accumulator
            ],
        ),
        compiler_params=pltpu.CompilerParams(
            # q axis shards across TensorCores (v7x megacore); kv axis is the
            # sequential online-softmax reduction.
            dimension_semantics=("parallel", "arbitrary"),
        ),
        cost_estimate=flash_cost,
    )(qkv, qkv, qkv)

    return out_p[:, :d_out] if pad else out_p


def self_attention_ref(x, wq, wk, wv):
    hp = jax.lax.Precision.HIGHEST
    q = jnp.dot(x, wq, precision=hp)
    k = jnp.dot(x, wk, precision=hp)
    v = jnp.dot(x, wv, precision=hp)
    s = jnp.dot(q, k.T, precision=hp) / jnp.sqrt(jnp.float32(k.shape[-1]))
    return jnp.dot(jax.nn.softmax(s, axis=-1), v, precision=hp)


if __name__ == "__main__":
    key = jax.random.PRNGKey(0)

    # Toy shapes implied by the module: seq=8, d_in=32, d_out=32.
    seq, d_in, d_out = 8, 32, 32
    kx, kq, kk, kv = jax.random.split(key, 4)
    # torch.rand -> uniform [0, 1)
    x = jax.random.uniform(kx, (seq, d_in), dtype=jnp.float32)
    wq = jax.random.uniform(kq, (d_in, d_out), dtype=jnp.float32)
    wk = jax.random.uniform(kk, (d_in, d_out), dtype=jnp.float32)
    wv = jax.random.uniform(kv, (d_in, d_out), dtype=jnp.float32)
    ref = self_attention_ref(x, wq, wk, wv)

    # Tight correctness check on the f32 MXU path.
    out_f32 = jax.block_until_ready(
        self_attention_v1(x, wq, wk, wv, mxu_dtype=jnp.float32))
    assert out_f32.shape == (seq, d_out)
    assert jnp.allclose(out_f32, ref, atol=2e-3, rtol=2e-3), \
        float(jnp.max(jnp.abs(out_f32 - ref)))

    # Default fast path: bf16 MXU feeds, f32 accumulation/statistics.  With
    # uniform [0,1) weights the softmax is near-argmax, so bf16 score rounding
    # can shift near-tied attention weights; compare at a bf16-commensurate
    # tolerance (the f32 path above is the tight check).
    out_bf16 = jax.block_until_ready(self_attention_v1(x, wq, wk, wv))
    assert out_bf16.shape == (seq, d_out)
    assert jnp.allclose(out_bf16, ref, atol=1e-1, rtol=1e-1), \
        float(jnp.max(jnp.abs(out_bf16 - ref)))

    # Exercise the multi-tile flash grid (4x4) and the lane-padding path
    # (d_out=48 -> padded to 128 lanes, output sliced back to 48).
    seq2, d_in2, d_out2 = 64, 32, 48
    ks = jax.random.split(key, 8)
    x2 = jax.random.uniform(ks[4], (seq2, d_in2), dtype=jnp.float32)
    wq2 = jax.random.uniform(ks[5], (d_in2, d_out2), dtype=jnp.float32)
    wk2 = jax.random.uniform(ks[6], (d_in2, d_out2), dtype=jnp.float32)
    wv2 = jax.random.uniform(ks[7], (d_in2, d_out2), dtype=jnp.float32)
    ref2 = self_attention_ref(x2, wq2, wk2, wv2)

    out2_f32 = jax.block_until_ready(
        self_attention_v1(x2, wq2, wk2, wv2, tq=16, tk=16, ts=16,
                          mxu_dtype=jnp.float32))
    assert out2_f32.shape == (seq2, d_out2)
    assert jnp.allclose(out2_f32, ref2, atol=2e-3, rtol=2e-3), \
        float(jnp.max(jnp.abs(out2_f32 - ref2)))

    out2_bf16 = jax.block_until_ready(
        self_attention_v1(x2, wq2, wk2, wv2, tq=16, tk=16, ts=16))
    assert jnp.allclose(out2_bf16, ref2, atol=1e-1, rtol=1e-1), \
        float(jnp.max(jnp.abs(out2_bf16 - ref2)))

    print("KERNEL_OK")
</pallas_src>

<mosaic_0001>
module attributes {stable_mosaic.version = 11 : i64} {
  func.func @_qkv_proj_kernel(%arg0: i32, %arg1: memref<8x32xf32, #tpu.memory_space<vmem>>, %arg2: memref<32x384xf32, #tpu.memory_space<vmem>>, %arg3: memref<8x384xf32, #tpu.memory_space<vmem>>) attributes {dimension_semantics = [#tpu.dimension_semantics<parallel>], iteration_bounds = array<i64: 1>, scalar_prefetch = 0 : i64, scratch_operands = 0 : i64, tpu.core_type = #tpu.core_type<tc>, window_params = [{transform_indices = @transform_0, window_bounds = array<i64: 8, 32>}, {pipeline_mode = #tpu.pipeline_mode<synchronous>, transform_indices = @transform_1, window_bounds = array<i64: 32, 384>}, {transform_indices = @transform_2, window_bounds = array<i64: 8, 384>}]} {
    %c0 = arith.constant 0 : index
    %c0_0 = arith.constant 0 : index
    %0 = vector.load %arg1[%c0, %c0_0] : memref<8x32xf32, #tpu.memory_space<vmem>>, vector<8x32xf32>
    %c0_1 = arith.constant 0 : index
    %c0_2 = arith.constant 0 : index
    %1 = vector.load %arg2[%c0_1, %c0_2] : memref<32x384xf32, #tpu.memory_space<vmem>>, vector<32x384xf32>
    %cst = arith.constant dense<0.000000e+00> : vector<8x384xf32>
    %2 = tpu.matmul %0, %1, %cst {dimension_numbers = #tpu.dot_dimension_numbers<[1], [0], [0], [1], [0, 0, 1, 1], [], []>} : vector<8x32xf32>, vector<32x384xf32>, vector<8x384xf32> -> vector<8x384xf32>
    %c0_3 = arith.constant 0 : index
    %c0_4 = arith.constant 0 : index
    %3 = vector.load %arg3[%c0_3, %c0_4] : memref<8x384xf32, #tpu.memory_space<vmem>>, vector<8x384xf32>
    tpu.vector_store %arg3[%c0_3, %c0_4], %2 {strides = array<i32>} : memref<8x384xf32, #tpu.memory_space<vmem>>, vector<8x384xf32>,
    return
  }
  func.func @transform_0(%arg0: i32) -> (i32, i32) {
    %c0_i32 = arith.constant 0 : i32
    %c0_i32_0 = arith.constant 0 : i32
    return %arg0, %c0_i32 : i32, i32
  }
  func.func @transform_1(%arg0: i32) -> (i32, i32) {
    %c0_i32 = arith.constant 0 : i32
    %c0_i32_0 = arith.constant 0 : i32
    %c0_i32_1 = arith.constant 0 : i32
    return %c0_i32, %c0_i32_0 : i32, i32
  }
  func.func @transform_2(%arg0: i32) -> (i32, i32) {
    %c0_i32 = arith.constant 0 : i32
    %c0_i32_0 = arith.constant 0 : i32
    return %arg0, %c0_i32 : i32, i32
  }
}

</mosaic_0001>

<bundles_post_ra>
// kernel: tpu_custom_call.1
= control target key start
LH: loop header
LB: loop body
LE: loop exit
PB: predicated region body
PF: predicated region fallthrough
CT: control target
= control target key end

     0   :  { %7 = vsyncpa [#allocation3], 0  ;;  %s337_s0 = inlined_call_operand.hbm [shape: f32[8,32], index: 0, kind: input, shape index: {}]   ;;  %s338_s1 = inlined_call_operand.hbm [shape: f32[32,384], index: 1, kind: input, shape index: {}]   ;;  %s339_s2 = inlined_call_operand.hbm [shape: f32[8,384], index: 2, kind: output, shape index: {}]  }
   0x1   :  { %8 = vsyncpa [#allocation6], 0 }
   0x2   :  { %9 = vsyncpa [#allocation4], 0  ;;  %s306_s9 = smov [#allocation2]   ;;  %s307_s11 = smov [#allocation5]  }
   0x3   :  { %s16_s10 = sshll.u32 %s306_s9, 4  ;;  %s25_s12 = sshll.u32 %s307_s11, 4  ;;  %s17_s10 = int_to_ptr.vmem [resolvable:$true] %s16_s10  ;;  %s26_s12 = int_to_ptr.vmem [resolvable:$true] %s25_s12 }
   0x4   :  { %s248_s13 = scalar_lea.vmem %s17_s10, 128  ;;  %p253_p1 = scmp.lt.s32.totalorder %s17_s10, %s17_s10 }
   0x5   :  { %p249_p0 = scmp.ne.s32.totalorder %s17_s10, %s248_s13  ;;  %p254_p2 = scmp.lt.s32.totalorder %s248_s13, %s248_s13 }
   0x7   :  { %p255_p3 = por %p254_p2, %p253_p1 }
   0x9   :  { %p256_p4 = pnand %p255_p3, %p249_p0 }
   0xb   :  { %259 = shalt.err (!%p256_p4)
}
   0xc   :  { %19 = dma.hbm_to_vmem [thread:$0]  %s337_s0, 128, %s17_s10, [#allocation3]  }
   0xd   :  { %s268_s16 = scalar_lea.vmem %s26_s12, 1536  ;;  %p273_p6 = scmp.lt.s32.totalorder %s26_s12, %s26_s12 }
   0xe   :  { %p269_p5 = scmp.ne.s32.totalorder %s26_s12, %s268_s16  ;;  %p274_p7 = scmp.lt.s32.totalorder %s268_s16, %s268_s16 }
  0x10   :  { %p275_p8 = por %p274_p7, %p273_p6 }
  0x12   :  { %p276_p9 = pnand %p275_p8, %p269_p5 }
  0x14   :  { %279 = shalt.err (!%p276_p9)
}
  0x15   :  { %s308_s17 = smov 384   ;;  %s309_s18 = smov 24  }
  0x16   :  { %31 = dma.hbm_to_vmem [thread:$0]  %s338_s1, 1536, %s26_s12, [#allocation6], %s308_s17, %s308_s17, %s309_s18  }
  0x17   :  { %300 = dma.done.wait [#allocation3], 128  }
  0x18   :  { %301 = vsyncadd [#allocation3], 4294967168 }
  0x19   :  { %302 = dma.done.wait [#allocation6], 1536  }
  0x1a   :  { %303 = vsyncadd [#allocation6], 4294965760  ;;  %v310_v0 = vmov 0.0   ;;  %vm311_vm0 = vmmov 0   ;;  %v49_v1 = vld [vmem:[#allocation5 + $0x50] sm:$0xff]  ;;  %v48_v2 = vld [vmem:[#allocation5 + $0x48] sm:$0xff] }
  0x1b   :  { %222 = vmatprep.subr.mxu1 %v310_v0  ;;  %119 = vmatprep.mubr.f32.mxu0 %v310_v0  ;;  %v50_v3 = vld [vmem:[#allocation5 + $0x58] sm:$0xff]  ;;  %v45_v5 = vld [vmem:[#allocation5 + $0x30] sm:$0xff]  ;;  %v47_v6 = vld [vmem:[#allocation5 + $0x40] sm:$0xff]  ;;  %vm51_vm1 = vcmask 261120   ;;  %s312_s0 = smov [#allocation7]  }
  0x1c   :  { %230 = vmatprep.mubr.msk.f32.mxu1 %vm311_vm0, %v310_v0  ;;  %79 = vmatprep.subr.mxu0 %v49_v1  ;;  %v46_v4 = vld [vmem:[#allocation5 + $0x38] sm:$0xff]  ;;  %v43_v7 = vld [vmem:[#allocation5 + $0x20] sm:$0xff]  ;;  %v44_v8 = vld [vmem:[#allocation5 + $0x28] sm:$0xff]  ;;  %s205_s1 = sshll.u32 %s312_s0, 4  ;;  %s206_s1 = int_to_ptr.vmem [resolvable:$true] %s205_s1 }
  0x1d   :  { %223 = vmatpush3.msra.mxu1 %v50_v3  ;;  %80 = vmatpush1.msra.mxu0 %v48_v2  ;;  %v42_v9 = vld [vmem:[#allocation5 + $0x18] sm:$0xff]  ;;  %v40_v10 = vld [vmem:[#allocation5 + $0x8] sm:$0xff]  ;;  %v41_v11 = vld [vmem:[#allocation5 + $0x10] sm:$0xff]  ;;  %s280_s21 = scalar_lea.vmem %s206_s1, 384  ;;  %p285_p11 = scmp.lt.s32.totalorder %s206_s1, %s206_s1 }
  0x1e   :  { %224 = vmatprep.subr.mxu1 %v310_v0  ;;  %81 = vmatprep.subr.mxu0 %v46_v4  ;;  %v39_v12 = vld [vmem:[#allocation5] sm:$0xff]  ;;  %v38_v13 = vld [vmem:[#allocation2] sm:$0xff]  ;;  %p281_p10 = scmp.ne.s32.totalorder %s206_s1, %s280_s21  ;;  %p286_p12 = scmp.lt.s32.totalorder %s280_s21, %s280_s21 }
  0x1f   :  { %225 = vmatpush3.msra.mxu1 %v47_v6  ;;  %82 = vmatpush1.msra.mxu0 %v45_v5 }
  0x20   :  { %226 = vmatprep.subr.mxu1 %v310_v0  ;;  %83 = vmatprep.subr.mxu0 %v43_v7  ;;  %p287_p13 = por %p286_p12, %p285_p11 }
  0x21   :  { %227 = vmatpush3.msra.mxu1 %v44_v8  ;;  %84 = vmatpush1.msra.mxu0 %v42_v9 }
  0x22   :  { %228 = vmatprep.subr.mxu1 %v310_v0  ;;  %85 = vmatprep.subr.mxu0 %v40_v10  ;;  %p288_p0 = pnand %p287_p13, %p281_p10 }
  0x23   :  { %229 = vmatpush3.msra.mxu1 %v41_v11  ;;  %86 = vmatpush1.msra.mxu0 %v39_v12 }
  0x24   :  { %231 = vmatmul.mubr.msk.f32.vlgmr.msra.gmra.mxu1 %vm51_vm1, %v38_v13  ;;  %215 = vmatmul.mubr.msk.f32.vlgmr.msra.gmra.mxu0 %vm51_vm1, %v38_v13 }
  0xe4   :  { %v192_v14 = vpop.f32.mrf.mxu1  ;;  %v121_v15 = vpop.f32.mrf.mxu0 }
  0xe5   :  { %198 = vst [vmem:[#allocation7 + $0x10] sm:$0xff] %v192_v14  ;;  %196 = vst [vmem:[#allocation7] sm:$0xff] %v121_v15 }
  0xe6   :  { %v232_v16 = vpop.f32.mrf.mxu1  ;;  %v123_v17 = vpop.f32.mrf.mxu0 }
  0xe7   :  { %197 = vst [vmem:[#allocation7 + $0x8] sm:$0xff] %v123_v17 }
  0xe8   :  { %291 = shalt.err (!%p288_p0)
}
  0xe9   :  { %208 = dma.vmem_to_hbm [thread:$0]  %s206_s1, 384, %s339_s2, [#allocation4]  }
  0xea   :  { %304 = dma.done.wait [#allocation4], 384  }
  0xeb   :  { %305 = vsyncadd [#allocation4], 4294966912 }
  0xec   :  { %212 = vsyncpa [#allocation3], 1 }
  0xed   :  { %213 = vsyncpa [#allocation6], 1 }
  0xee   :  { %214 = vsyncpa [#allocation4], 1 }

</bundles_post_ra>
